<compile_context>
chip_gen: v5e
topology: v5e:2x2
jax: 0.10.0
libtpu: 0.0.40
codegen_flags: <defaults>
</compile_context>

<pallas_src>
import functools

import jax
import jax.numpy as jnp
from jax.experimental import pallas as pl
from jax.experimental.pallas import tpu as pltpu


def _round_up(x, m):
    return (x + m - 1) // m * m


def _corr2d_kernel(w_ref, b_ref, *refs, kh, kw, has_halo):
    """One output row tile of 2-D cross-correlation + bias.

    w_ref : SMEM (kh*kw,)   kernel taps, flattened row-major
    b_ref : SMEM (1,)       bias
    x_ref : VMEM (xr, Wp)   input rows for this tile (xr = th or th + kh - 1)
    h_ref : VMEM (hb, Wp)   (only if has_halo) rows just below the main block;
                            only the first kh-1 of them are ever needed
    o_ref : VMEM (th, Wp)   output rows; cols >= Wo / rows >= Ho are masked by
                            the partial-block write-back DMA
    """
    if has_halo:
        x_ref, h_ref, o_ref = refs
    else:
        x_ref, o_ref = refs
    th, wp = o_ref.shape

    xv = x_ref[...].astype(jnp.float32)              # single tile load, f32 in-reg
    if has_halo:
        xv = jnp.concatenate([xv, h_ref[...].astype(jnp.float32)], axis=0)

    # Bias-initialised accumulator (saves a full-tile add at the end).
    acc = jnp.full((th, wp), b_ref[0], dtype=jnp.float32)

    for j in range(kw):
        # Lane shift by j with ONE XLU roll over the whole tile (hoisted out of
        # the kh loop per review).  Invariant: a valid output column c < Wo only
        # needs input column c + j <= W - 1 < Wp, so the roll wrap-around and
        # the garbage columns >= W only feed output columns >= Wo, which are
        # outside the (Ho, Wo) output array and masked on write-back.
        xj = xv if j == 0 else pltpu.roll(xv, wp - j, axis=1)
        for i in range(kh):
            rows = xj if xj.shape[0] == th else xj[i:i + th, :]
            acc = acc + w_ref[i * kw + j] * rows

    o_ref[...] = acc.astype(o_ref.dtype)


def conv2d_forward(x, weight, bias, *, max_tile_rows=4096):
    """corr2d(x, weight) + bias — forward of the PyTorch Conv2D module."""
    H, W = x.shape
    kh, kw = weight.shape
    Ho, Wo = H - kh + 1, W - kw + 1
    if Ho <= 0 or Wo <= 0:
        raise ValueError("kernel larger than input")

    itemsize = jnp.dtype(x.dtype).itemsize
    # Lane-dense width purely via the BlockSpec (no copy): columns >= W read
    # garbage that only ever pollutes output columns >= Wo (masked write-back).
    Wp = _round_up(W, 128)

    # Sublane quantum for the wire dtype (f32: 8, bf16: 16, int8/fp8: 32).
    sub = 8 if itemsize >= 4 else (16 if itemsize == 2 else 32)
    halo_rows = _round_up(kh - 1, sub) if kh > 1 else 0
    align = halo_rows if kh > 1 else sub      # halo index math needs align | th

    # Row tile: ~4 MiB of f32 per buffer.  Double-buffered input + output plus
    # in-kernel temporaries (~7 tiles live) stays well under the 48 MiB limit.
    budget_rows = max(align, (4 * 1024 * 1024) // (4 * Wp))
    th = max(align,
             min(budget_rows, max_tile_rows, _round_up(Ho, align)) // align * align)
    nt = pl.cdiv(Ho, th)
    # Prefer an even tile count so the "parallel" row axis load-balances across
    # v7x's two TensorCores.
    if nt > 1 and nt % 2 == 1:
        th2 = max(align, _round_up(pl.cdiv(Ho, nt + 1), align))
        if pl.cdiv(Ho, th2) % 2 == 0:
            th, nt = th2, pl.cdiv(Ho, th2)
    if nt == 1:
        th = Ho                                # single block == full output rows

    single = nt == 1
    has_halo = (not single) and kh > 1
    xb_rows = th + kh - 1 if single else th    # input rows in the main block

    in_specs = [
        pl.BlockSpec(memory_space=pltpu.MemorySpace.SMEM),    # weight taps
        pl.BlockSpec(memory_space=pltpu.MemorySpace.SMEM),    # bias
        pl.BlockSpec((xb_rows, Wp), lambda t: (t, 0)),        # main x rows
    ]
    args = [weight.astype(jnp.float32).reshape(-1),
            bias.astype(jnp.float32).reshape(-1),
            x]                                 # x keeps its source dtype on the wire

    if has_halo:
        # Row halo (kh > 1, multi-tile): a second view of x covering rows
        # [(t+1)*th, (t+1)*th + halo_rows), clamped to the last in-bounds
        # block.  Clamping only happens when (t+1)*th >= H, i.e. when those
        # rows are not needed by any valid output row of this tile.
        n_hb = pl.cdiv(H, halo_rows)
        blocks_per_tile = th // halo_rows      # exact: align == halo_rows | th
        in_specs.append(pl.BlockSpec(
            (halo_rows, Wp),
            lambda t: (jnp.minimum((t + 1) * blocks_per_tile, n_hb - 1), 0)))
        args.append(x)

    # Accurate (advisory) traffic estimate for the kernel itself.
    read_bytes = nt * xb_rows * W * itemsize
    if has_halo:
        read_bytes += nt * halo_rows * W * itemsize
    cost = pl.CostEstimate(flops=2 * kh * kw * Ho * Wo,
                           transcendentals=0,
                           bytes_accessed=int(read_bytes + Ho * Wo * 4))

    kernel = functools.partial(_corr2d_kernel, kh=kh, kw=kw, has_halo=has_halo)
    return pl.pallas_call(
        kernel,
        out_shape=jax.ShapeDtypeStruct((Ho, Wo), jnp.float32),
        grid=(nt,),
        in_specs=in_specs,
        out_specs=pl.BlockSpec((th, Wp), lambda t: (t, 0)),
        compiler_params=pltpu.CompilerParams(
            dimension_semantics=("parallel",),
            vmem_limit_bytes=48 * 1024 * 1024),
        cost_estimate=cost,
    )(*args)


def corr2d_ref(x, k, b):
    """Pure-JAX reference of the PyTorch corr2d + bias."""
    kh, kw = k.shape
    Ho, Wo = x.shape[0] - kh + 1, x.shape[1] - kw + 1
    xf = x.astype(jnp.float32)
    out = jnp.zeros((Ho, Wo), jnp.float32)
    for i in range(kh):
        for j in range(kw):
            out = out + k[i, j] * xf[i:i + Ho, j:j + Wo]
    return out + b[0]


if __name__ == "__main__":
    keys = jax.random.split(jax.random.PRNGKey(0), 6)

    # --- 1) The module's own usage: kernel_size=(1, 2), X = ones((6, 8)). ---
    weight = jax.random.uniform(keys[0], (1, 2), dtype=jnp.float32)
    bias = jnp.zeros((1,), dtype=jnp.float32)
    x_small = jnp.ones((6, 8), dtype=jnp.float32)
    y_small = jax.block_until_ready(conv2d_forward(x_small, weight, bias))
    assert y_small.shape == (6, 7)
    assert jnp.allclose(y_small, corr2d_ref(x_small, weight, bias), atol=1e-5)

    # --- 2) Multi-tile, kh == 1, ragged width (W % 128 != 0, Ho % th != 0). ---
    x_med = jax.random.normal(keys[3], (200, 200), dtype=jnp.float32)
    y_k1 = jax.block_until_ready(
        conv2d_forward(x_med, weight, bias, max_tile_rows=64))
    assert y_k1.shape == (200, 199)
    assert jnp.allclose(y_k1, corr2d_ref(x_med, weight, bias),
                        atol=1e-4, rtol=1e-4)

    # --- 3) Multi-tile with a row halo (3x3 kernel) + even-nt rebalance. ---
    w33 = jax.random.uniform(keys[1], (3, 3), dtype=jnp.float32)
    b33 = jax.random.uniform(keys[2], (1,), dtype=jnp.float32)
    y33 = jax.block_until_ready(
        conv2d_forward(x_med, w33, b33, max_tile_rows=72))
    assert y33.shape == (198, 198)
    assert jnp.allclose(y33, corr2d_ref(x_med, w33, b33), atol=1e-4, rtol=1e-4)

    # --- 4) bf16 input stays bf16 on the wire; accumulation is f32. ---
    w22 = jax.random.uniform(keys[4], (2, 2), dtype=jnp.float32)
    b22 = jnp.zeros((1,), dtype=jnp.float32)
    x_bf = jax.random.normal(keys[5], (48, 144), dtype=jnp.float32).astype(jnp.bfloat16)
    y_bf = jax.block_until_ready(
        conv2d_forward(x_bf, w22, b22, max_tile_rows=16))
    assert y_bf.shape == (47, 143)
    assert jnp.allclose(y_bf, corr2d_ref(x_bf, w22, b22), atol=1e-4, rtol=1e-4)

    print("KERNEL_OK")
</pallas_src>

<mosaic_0001>
module attributes {stable_mosaic.version = 11 : i64} {
  func.func @_corr2d_kernel(%arg0: i32, %arg1: memref<2xf32, #tpu.memory_space<smem>>, %arg2: memref<1xf32, #tpu.memory_space<smem>>, %arg3: memref<6x128xf32, #tpu.memory_space<vmem>>, %arg4: memref<6x128xf32, #tpu.memory_space<vmem>>) attributes {dimension_semantics = [#tpu.dimension_semantics<parallel>], iteration_bounds = array<i64: 1>, scalar_prefetch = 0 : i64, scratch_operands = 0 : i64, tpu.core_type = #tpu.core_type<tc>, window_params = [{transform_indices = @transform_0, window_bounds = array<i64: 2>}, {transform_indices = @transform_1, window_bounds = array<i64: 1>}, {transform_indices = @transform_2, window_bounds = array<i64: 6, 128>}, {transform_indices = @transform_3, window_bounds = array<i64: 6, 128>}]} {
    %c0 = arith.constant 0 : index
    %c0_0 = arith.constant 0 : index
    %0 = vector.load %arg3[%c0, %c0_0] : memref<6x128xf32, #tpu.memory_space<vmem>>, vector<6x128xf32>
    %c0_1 = arith.constant 0 : index
    %1 = memref.load %arg2[%c0_1] : memref<1xf32, #tpu.memory_space<smem>>
    %2 = vector.broadcast %1 : f32 to vector<6x128xf32>
    %c0_2 = arith.constant 0 : index
    %3 = memref.load %arg1[%c0_2] : memref<2xf32, #tpu.memory_space<smem>>
    %4 = vector.broadcast %3 : f32 to vector<6x128xf32>
    %5 = arith.mulf %4, %0 : vector<6x128xf32>
    %6 = arith.addf %2, %5 : vector<6x128xf32>
    %c127_i32 = arith.constant 127 : i32
    %7 = tpu.dynamic_rotate %0 by %c127_i32 dim 1 : vector<6x128xf32>, i32 -> vector<6x128xf32>
    %c1 = arith.constant 1 : index
    %8 = memref.load %arg1[%c1] : memref<2xf32, #tpu.memory_space<smem>>
    %9 = vector.broadcast %8 : f32 to vector<6x128xf32>
    %10 = arith.mulf %9, %7 : vector<6x128xf32>
    %11 = arith.addf %6, %10 : vector<6x128xf32>
    %c0_3 = arith.constant 0 : index
    %c0_4 = arith.constant 0 : index
    %12 = vector.load %arg4[%c0_3, %c0_4] : memref<6x128xf32, #tpu.memory_space<vmem>>, vector<6x128xf32>
    tpu.vector_store %arg4[%c0_3, %c0_4], %11 {strides = array<i32>} : memref<6x128xf32, #tpu.memory_space<vmem>>, vector<6x128xf32>,
    return
  }
  func.func @transform_0(%arg0: i32) -> i32 {
    %c0_i32 = arith.constant 0 : i32
    %c0_i32_0 = arith.constant 0 : i32
    return %c0_i32 : i32
  }
  func.func @transform_1(%arg0: i32) -> i32 {
    %c0_i32 = arith.constant 0 : i32
    %c0_i32_0 = arith.constant 0 : i32
    return %c0_i32 : i32
  }
  func.func @transform_2(%arg0: i32) -> (i32, i32) {
    %c0_i32 = arith.constant 0 : i32
    %c0_i32_0 = arith.constant 0 : i32
    return %arg0, %c0_i32 : i32, i32
  }
  func.func @transform_3(%arg0: i32) -> (i32, i32) {
    %c0_i32 = arith.constant 0 : i32
    %c0_i32_0 = arith.constant 0 : i32
    return %arg0, %c0_i32 : i32, i32
  }
}

</mosaic_0001>

<bundles_post_ra>
// kernel: tpu_custom_call.1
= control target key start
LH: loop header
LB: loop body
LE: loop exit
PB: predicated region body
PF: predicated region fallthrough
CT: control target
= control target key end

     0   :  { %9 = vsyncpa [#allocation6], 0  ;;  %s182_s0 = inlined_call_operand.vmem [shape: f32[2], index: 0, kind: input, shape index: {}]   ;;  %s183_s1 = inlined_call_operand.<no memory space> [shape: f32[1], index: 1, kind: input, shape index: {}]   ;;  %s184_s2 = inlined_call_operand.hbm [shape: f32[6,8], index: 2, kind: input, shape index: {}]   ;;  %s185_s3 = inlined_call_operand.hbm [shape: f32[6,7], index: 3, kind: output, shape index: {}]  }
   0x1   :  { %10 = vsyncpa [#allocation4], 0 }
   0x2   :  { %11 = vsyncpa [#allocation5], 0  ;;  %s17_s14 = sshll.u32 %s182_s0, 4  ;;  %s28_s17 = sshll.u32 %s184_s2, 4  ;;  %s18_s14 = int_to_ptr.vmem [resolvable:$true] %s17_s14  ;;  %s29_s17 = int_to_ptr.hbm [resolvable:$true] %s28_s17 }
   0x3   :  { %s146_s18 = smov [#allocation3]   ;;  %s147_s19 = smov [#allocation7]  }
   0x4   :  { %20 = dma.vmem_to_smem %s18_s14, 16, %s146_s18, [#allocation6]  }
   0x5   :  { %s30_s20 = sshll.u32 %s147_s19, 4  ;;  %s31_s20 = int_to_ptr.vmem [resolvable:$true] %s30_s20 }
   0x6   :  { %33 = dma.hbm_to_vmem [thread:$0]  %s29_s17, 128, %s31_s20, [#allocation4]  }
   0x7   :  { %140 = dma.done.wait [#allocation6], 16  }
   0x8   :  { %141 = vsyncadd [#allocation6], 4294967280 }
   0x9   :  { %142 = dma.done.wait [#allocation4], 128  }
   0xa   :  { %143 = vsyncadd [#allocation4], 4294967168 }
   0xb   :  { %42 = sfence }
   0xc   :  { %v43_v0 = vld [vmem:[#allocation7] sm:$0x3f]  ;;  %s148_s21 = smov 127   ;;  %s46_s0 = sld [smem:[#allocation3]]  ;;  %v45_v3 = vstv %s183_s1 }
   0xd   :  { %50 = vrot.lane.b32.xlu0 %v43_v0, %s148_s21  ;;  %s75_s22 = sld [smem:[#allocation3 + $0x1]]  ;;  %s149_s24 = smov [#allocation8]  }
   0xe   :  { %s62_s25 = sshll.u32 %s149_s24, 4  ;;  %s64_s28 = sshll.u32 %s185_s3, 4  ;;  %s63_s25 = int_to_ptr.vmem [resolvable:$true] %s62_s25  ;;  %s65_s28 = int_to_ptr.hbm [resolvable:$true] %s64_s28 }
  0x12   :  { %v47_v1 = vstv %s46_s0 }
  0x13   :  { %v48_v2 = vmul.f32 %v47_v1, %v43_v0  ;;  %v53_v4 = vstv %s75_s22 }
  0x15   :  { %v49_v5 = vadd.f32 %v48_v2, %v45_v3 }
  0x7f   :  { %v51_v6 = vpop.permute.xlu0 %50 }
  0x80   :  { %v54_v7 = vmul.f32 %v53_v4, %v51_v6 }
  0x82   :  { %v55_v8 = vadd.f32 %v54_v7, %v49_v5 }
  0x84   :  { %56 = vst [vmem:[#allocation8] sm:$0x3f] %v55_v8 }
  0x85   :  { %67 = dma.vmem_to_hbm [thread:$0]  %s63_s25, 128, %s65_s28, [#allocation5]  }
  0x86   :  { %144 = dma.done.wait [#allocation5], 128  }
  0x87   :  { %145 = vsyncadd [#allocation5], 4294967168 }
  0x88   :  { %72 = vsyncpa [#allocation4], 1 }
  0x89   :  { %73 = vsyncpa [#allocation5], 1 }
  0x8a   :  { %74 = vsyncpa [#allocation6], 1 }

</bundles_post_ra>
